<compile_context>
chip_gen: v7x
topology: tpu7x:2x2x1
jax: 0.10.0
libtpu: 0.0.40
codegen_flags: <defaults>
</compile_context>

<pallas_src>
import functools

import jax
import jax.numpy as jnp
from jax.experimental import pallas as pl
from jax.experimental.pallas import tpu as pltpu

_BN_EPS = 1e-5


# ----------------------------------------------------------------------------
# Single fused kernel: 1x1 conv/BN/PReLU -> replicate-pad + 3x3 conv/BN/PReLU
#                      -> 1x1 conv/BN/PReLU -> + residual
# Per grid step: one image, laid out as (C, H*W) (channels on sublanes,
# flattened spatial on lanes).  All weights are VMEM-resident.
# ----------------------------------------------------------------------------
def _bottleneck_kernel(H, W, x_ref, w1_ref, t1_ref, a1_ref,
                       w2_ref, t2_ref, a2_ref,
                       w3_ref, t3_ref, a3_ref, o_ref):
    HW = H * W
    x = x_ref[0]                               # (C, HW), native dtype
    cdt = x.dtype

    # Boundary masks on the flattened spatial (lane) axis, shape (1, HW).
    idx = jax.lax.broadcasted_iota(jnp.int32, (1, HW), 1)
    col = idx % W
    col_first = col == 0
    col_last = col == (W - 1)
    row_first = idx < W
    row_last = idx >= (HW - W)

    def rot(v, s):
        # Circular shift along lanes: out[:, i] = v[:, (i + s) % HW].
        return jnp.concatenate([v[:, s:], v[:, :s]], axis=1)

    # ---- layer 1: 1x1 conv (BN scale folded into weights) + shift + PReLU ----
    h1 = jnp.dot(w1_ref[...], x, preferred_element_type=jnp.float32)  # (Ci, HW)
    h1 = h1 + t1_ref[...]
    h1 = jnp.where(h1 >= 0.0, h1, a1_ref[...] * h1)
    h1 = h1.astype(cdt)

    # ---- ReplicationPad2d(1) + 3x3 conv as 9 shifted matmuls (f32 acc) ----
    # W-direction shifted variants (dw = -1, 0, +1), edges replicated.
    wm1 = jnp.where(col_first, h1, rot(h1, -1))        # value at w-1 (clamped)
    wp1 = jnp.where(col_last, h1, rot(h1, 1))          # value at w+1 (clamped)
    w_shifted = (wm1, h1, wp1)

    acc = jnp.zeros(h1.shape, jnp.float32)
    for kh, dh in enumerate((-1, 0, 1)):
        for kw in range(3):
            base = w_shifted[kw]
            if dh == -1:
                patch = jnp.where(row_first, base, rot(base, -W))
            elif dh == 1:
                patch = jnp.where(row_last, base, rot(base, W))
            else:
                patch = base
            acc = acc + jnp.dot(w2_ref[kh * 3 + kw], patch,
                                preferred_element_type=jnp.float32)

    h2 = acc + t2_ref[...]
    h2 = jnp.where(h2 >= 0.0, h2, a2_ref[...] * h2)
    h2 = h2.astype(cdt)

    # ---- layer 3: 1x1 conv + shift + PReLU + residual ----
    y = jnp.dot(w3_ref[...], h2, preferred_element_type=jnp.float32)  # (C, HW)
    y = y + t3_ref[...]
    y = jnp.where(y >= 0.0, y, a3_ref[...] * y)
    y = y + x.astype(jnp.float32)

    o_ref[0] = y.astype(o_ref.dtype)


# ----------------------------------------------------------------------------
# Parameter folding (inference BN + conv bias -> weight scale / additive shift)
# ----------------------------------------------------------------------------
def _fold_1x1(w_oihw, bias, gamma, beta, mean, var, compute_dtype):
    """w_oihw: (Cout, Cin, 1, 1) -> folded (Cout, Cin) and shift (Cout, 1)."""
    scale = gamma / jnp.sqrt(var + _BN_EPS)                       # (Cout,)
    w = (w_oihw[:, :, 0, 0] * scale[:, None]).astype(compute_dtype)
    shift = ((bias - mean) * scale + beta).astype(jnp.float32).reshape(-1, 1)
    return w, shift


def resnet_block_forward(x_nchw, p):
    """Fused Pallas bottleneck; NCHW in/out (no layout transposes needed)."""
    N, C, H, W = x_nchw.shape
    Ci = p["w1"].shape[0]
    cdt = x_nchw.dtype
    HW = H * W

    w1, t1 = _fold_1x1(p["w1"], p["b1"], p["g1"], p["be1"], p["m1"], p["v1"], cdt)
    a1 = p["a1"].astype(jnp.float32).reshape(Ci, 1)

    s2 = p["g2"] / jnp.sqrt(p["v2"] + _BN_EPS)                    # (Ci,)
    # (Cout, Cin, 3, 3) -> (KH, KW, Cout, Cin) -> (9, Cout, Cin), BN folded.
    w2 = (jnp.transpose(p["w2"] * s2[:, None, None, None], (2, 3, 0, 1))
          .reshape(9, Ci, Ci).astype(cdt))
    t2 = ((p["b2"] - p["m2"]) * s2 + p["be2"]).astype(jnp.float32).reshape(Ci, 1)
    a2 = p["a2"].astype(jnp.float32).reshape(Ci, 1)

    w3, t3 = _fold_1x1(p["w3"], p["b3"], p["g3"], p["be3"], p["m3"], p["v3"], cdt)
    a3 = p["a3"].astype(jnp.float32).reshape(C, 1)

    x_flat = x_nchw.reshape(N, C, HW)     # contiguous reshape, no data movement
    kernel = functools.partial(_bottleneck_kernel, H, W)

    out_flat = pl.pallas_call(
        kernel,
        out_shape=jax.ShapeDtypeStruct((N, C, HW), cdt),
        grid=(N,),
        in_specs=[
            pl.BlockSpec((1, C, HW), lambda n: (n, 0, 0)),    # x (per image)
            pl.BlockSpec((Ci, C), lambda n: (0, 0)),          # w1 (resident)
            pl.BlockSpec((Ci, 1), lambda n: (0, 0)),          # shift1
            pl.BlockSpec((Ci, 1), lambda n: (0, 0)),          # alpha1
            pl.BlockSpec((9, Ci, Ci), lambda n: (0, 0, 0)),   # w2 taps
            pl.BlockSpec((Ci, 1), lambda n: (0, 0)),          # shift2
            pl.BlockSpec((Ci, 1), lambda n: (0, 0)),          # alpha2
            pl.BlockSpec((C, Ci), lambda n: (0, 0)),          # w3
            pl.BlockSpec((C, 1), lambda n: (0, 0)),           # shift3
            pl.BlockSpec((C, 1), lambda n: (0, 0)),           # alpha3
        ],
        out_specs=pl.BlockSpec((1, C, HW), lambda n: (n, 0, 0)),
        compiler_params=pltpu.CompilerParams(
            dimension_semantics=("parallel",)),
    )(x_flat, w1, t1, a1, w2, t2, a2, w3, t3, a3)

    return out_flat.reshape(N, C, H, W)


# ----------------------------------------------------------------------------
# Pure-JAX reference (NCHW, lax.conv) used to validate the kernel path
# ----------------------------------------------------------------------------
def resnet_block_ref(x, p):
    def conv_bn_prelu(h, w, b, g, be, m, v, a, pad=0):
        y = jax.lax.conv_general_dilated(
            h, w, (1, 1), [(pad, pad), (pad, pad)],
            dimension_numbers=("NCHW", "OIHW", "NCHW"))
        y = y + b[None, :, None, None]
        y = (y - m[None, :, None, None]) / jnp.sqrt(v[None, :, None, None] + _BN_EPS)
        y = y * g[None, :, None, None] + be[None, :, None, None]
        a4 = a[None, :, None, None]
        return jnp.where(y >= 0, y, a4 * y)

    h = conv_bn_prelu(x, p["w1"], p["b1"], p["g1"], p["be1"], p["m1"], p["v1"], p["a1"])
    h = jnp.pad(h, ((0, 0), (0, 0), (1, 1), (1, 1)), mode="edge")
    h = conv_bn_prelu(h, p["w2"], p["b2"], p["g2"], p["be2"], p["m2"], p["v2"], p["a2"])
    h = conv_bn_prelu(h, p["w3"], p["b3"], p["g3"], p["be3"], p["m3"], p["v3"], p["a3"])
    return h + x


# ----------------------------------------------------------------------------
def make_params(key, in_channels, inner_channels):
    ks = jax.random.split(key, 32)
    C, Ci = in_channels, inner_channels
    n = lambda k, s, scale=0.1: scale * jax.random.normal(k, s, jnp.float32)
    p = {
        # in_Conv2dBlock (1x1)
        "w1": n(ks[0], (Ci, C, 1, 1)), "b1": n(ks[1], (Ci,)),
        "g1": 1.0 + n(ks[2], (Ci,)), "be1": n(ks[3], (Ci,)),
        "m1": n(ks[4], (Ci,)), "v1": 1.0 + 0.1 * jax.random.uniform(ks[5], (Ci,)),
        "a1": 0.25 + n(ks[6], (Ci,), 0.05),
        # middle_Conv2dBlock (3x3)
        "w2": n(ks[7], (Ci, Ci, 3, 3)), "b2": n(ks[8], (Ci,)),
        "g2": 1.0 + n(ks[9], (Ci,)), "be2": n(ks[10], (Ci,)),
        "m2": n(ks[11], (Ci,)), "v2": 1.0 + 0.1 * jax.random.uniform(ks[12], (Ci,)),
        "a2": 0.25 + n(ks[13], (Ci,), 0.05),
        # out_Conv2dBlock (1x1)
        "w3": n(ks[14], (C, Ci, 1, 1)), "b3": n(ks[15], (C,)),
        "g3": 1.0 + n(ks[16], (C,)), "be3": n(ks[17], (C,)),
        "m3": n(ks[18], (C,)), "v3": 1.0 + 0.1 * jax.random.uniform(ks[19], (C,)),
        "a3": 0.25 + n(ks[20], (C,), 0.05),
    }
    return p


if __name__ == "__main__":
    key = jax.random.PRNGKey(0)
    k_x, k_p = jax.random.split(key)

    N, C, H, W = 2, 4, 16, 16          # in_channels = inner_channels = 4
    x = jax.random.normal(k_x, (N, C, H, W), jnp.float32)
    params = make_params(k_p, C, C)

    out = jax.jit(resnet_block_forward)(x, params)
    out = jax.block_until_ready(out)

    ref = resnet_block_ref(x, params)
    assert out.shape == x.shape and out.dtype == x.dtype
    assert jnp.allclose(out, ref, atol=1e-4, rtol=1e-4), (
        float(jnp.max(jnp.abs(out - ref))))

    print("KERNEL_OK")
</pallas_src>

<mosaic_0001>
module attributes {stable_mosaic.version = 11 : i64} {
  func.func @_bottleneck_kernel(%arg0: i32, %arg1: memref<1x4x256xf32, #tpu.memory_space<vmem>>, %arg2: memref<4x4xf32, #tpu.memory_space<vmem>>, %arg3: memref<4x1xf32, #tpu.memory_space<vmem>>, %arg4: memref<4x1xf32, #tpu.memory_space<vmem>>, %arg5: memref<9x4x4xf32, #tpu.memory_space<vmem>>, %arg6: memref<4x1xf32, #tpu.memory_space<vmem>>, %arg7: memref<4x1xf32, #tpu.memory_space<vmem>>, %arg8: memref<4x4xf32, #tpu.memory_space<vmem>>, %arg9: memref<4x1xf32, #tpu.memory_space<vmem>>, %arg10: memref<4x1xf32, #tpu.memory_space<vmem>>, %arg11: memref<1x4x256xf32, #tpu.memory_space<vmem>>) attributes {dimension_semantics = [#tpu.dimension_semantics<parallel>], iteration_bounds = array<i64: 2>, scalar_prefetch = 0 : i64, scratch_operands = 0 : i64, tpu.core_type = #tpu.core_type<tc>, window_params = [{transform_indices = @transform_0, window_bounds = array<i64: 1, 4, 256>}, {pipeline_mode = #tpu.pipeline_mode<synchronous>, transform_indices = @transform_1, window_bounds = array<i64: 4, 4>}, {pipeline_mode = #tpu.pipeline_mode<synchronous>, transform_indices = @transform_2, window_bounds = array<i64: 4, 1>}, {pipeline_mode = #tpu.pipeline_mode<synchronous>, transform_indices = @transform_3, window_bounds = array<i64: 4, 1>}, {pipeline_mode = #tpu.pipeline_mode<synchronous>, transform_indices = @transform_4, window_bounds = array<i64: 9, 4, 4>}, {pipeline_mode = #tpu.pipeline_mode<synchronous>, transform_indices = @transform_5, window_bounds = array<i64: 4, 1>}, {pipeline_mode = #tpu.pipeline_mode<synchronous>, transform_indices = @transform_6, window_bounds = array<i64: 4, 1>}, {pipeline_mode = #tpu.pipeline_mode<synchronous>, transform_indices = @transform_7, window_bounds = array<i64: 4, 4>}, {pipeline_mode = #tpu.pipeline_mode<synchronous>, transform_indices = @transform_8, window_bounds = array<i64: 4, 1>}, {pipeline_mode = #tpu.pipeline_mode<synchronous>, transform_indices = @transform_9, window_bounds = array<i64: 4, 1>}, {transform_indices = @transform_10, window_bounds = array<i64: 1, 4, 256>}]} {
    %c0 = arith.constant 0 : index
    %c0_0 = arith.constant 0 : index
    %c0_1 = arith.constant 0 : index
    %0 = vector.load %arg1[%c0, %c0_0, %c0_1] : memref<1x4x256xf32, #tpu.memory_space<vmem>>, vector<1x4x256xf32>
    %1 = vector.shape_cast %0 : vector<1x4x256xf32> to vector<4x256xf32>
    %2 = tpu.iota {dimensions = array<i32: 1>} : vector<1x256xi32>
    %c16_i32 = arith.constant 16 : i32
    %c0_i32 = arith.constant 0 : i32
    %3 = arith.cmpi eq, %c16_i32, %c0_i32 : i32
    %c1_i32 = arith.constant 1 : i32
    %4 = arith.select %3, %c1_i32, %c16_i32 : i32
    %5 = vector.broadcast %4 : i32 to vector<1x256xi32>
    %6 = arith.remsi %2, %5 : vector<1x256xi32>
    %c0_i32_2 = arith.constant 0 : i32
    %7 = vector.broadcast %c0_i32_2 : i32 to vector<1x256xi32>
    %8 = arith.cmpi ne, %6, %7 : vector<1x256xi32>
    %c0_i32_3 = arith.constant 0 : i32
    %9 = vector.broadcast %c0_i32_3 : i32 to vector<1x256xi32>
    %10 = arith.cmpi slt, %6, %9 : vector<1x256xi32>
    %c0_i32_4 = arith.constant 0 : i32
    %11 = arith.cmpi slt, %4, %c0_i32_4 : i32
    %12 = vector.broadcast %11 : i1 to vector<1x256xi1>
    %13 = vector.broadcast %12 : vector<1x256xi1> to vector<1x256xi1>
    %14 = arith.xori %10, %13 : vector<1x256xi1>
    %15 = arith.andi %14, %8 : vector<1x256xi1>
    %16 = vector.broadcast %4 : i32 to vector<1x256xi32>
    %17 = arith.addi %6, %16 : vector<1x256xi32>
    %18 = arith.select %15, %17, %6 : vector<1x256xi1>, vector<1x256xi32>
    %c0_i32_5 = arith.constant 0 : i32
    %19 = vector.broadcast %c0_i32_5 : i32 to vector<1x256xi32>
    %20 = arith.cmpi eq, %18, %19 : vector<1x256xi32>
    %c15_i32 = arith.constant 15 : i32
    %21 = vector.broadcast %c15_i32 : i32 to vector<1x256xi32>
    %22 = arith.cmpi eq, %18, %21 : vector<1x256xi32>
    %c16_i32_6 = arith.constant 16 : i32
    %23 = vector.broadcast %c16_i32_6 : i32 to vector<1x256xi32>
    %24 = arith.cmpi slt, %2, %23 : vector<1x256xi32>
    %c240_i32 = arith.constant 240 : i32
    %25 = vector.broadcast %c240_i32 : i32 to vector<1x256xi32>
    %26 = arith.cmpi sge, %2, %25 : vector<1x256xi32>
    %c0_7 = arith.constant 0 : index
    %c0_8 = arith.constant 0 : index
    %27 = vector.load %arg2[%c0_7, %c0_8] : memref<4x4xf32, #tpu.memory_space<vmem>>, vector<4x4xf32>
    %cst = arith.constant dense<0.000000e+00> : vector<4x256xf32>
    %28 = tpu.matmul %27, %1, %cst {dimension_numbers = #tpu.dot_dimension_numbers<[1], [0], [0], [1], [0, 0, 1, 1], [], []>} : vector<4x4xf32>, vector<4x256xf32>, vector<4x256xf32> -> vector<4x256xf32>
    %c0_9 = arith.constant 0 : index
    %c0_10 = arith.constant 0 : index
    %29 = vector.load %arg3[%c0_9, %c0_10] : memref<4x1xf32, #tpu.memory_space<vmem>>, vector<4x1xf32>
    %30 = vector.broadcast %29 : vector<4x1xf32> to vector<4x256xf32>
    %31 = arith.addf %28, %30 : vector<4x256xf32>
    %cst_11 = arith.constant 0.000000e+00 : f32
    %32 = vector.broadcast %cst_11 : f32 to vector<4x256xf32>
    %33 = arith.cmpf oge, %31, %32 : vector<4x256xf32>
    %c0_12 = arith.constant 0 : index
    %c0_13 = arith.constant 0 : index
    %34 = vector.load %arg4[%c0_12, %c0_13] : memref<4x1xf32, #tpu.memory_space<vmem>>, vector<4x1xf32>
    %35 = vector.broadcast %34 : vector<4x1xf32> to vector<4x256xf32>
    %36 = arith.mulf %35, %31 : vector<4x256xf32>
    %37 = arith.select %33, %31, %36 : vector<4x256xi1>, vector<4x256xf32>
    %38 = vector.extract_strided_slice %37 {offsets = [0, 255], sizes = [4, 1], strides = [1, 1]} : vector<4x256xf32> to vector<4x1xf32>
    %39 = vector.extract_strided_slice %37 {offsets = [0, 0], sizes = [4, 255], strides = [1, 1]} : vector<4x256xf32> to vector<4x255xf32>
    %40 = tpu.concatenate %38, %39 in 1 : vector<4x1xf32>, vector<4x255xf32> -> vector<4x256xf32>
    %41 = vector.shape_cast %20 : vector<1x256xi1> to vector<1x256xi1>
    %42 = vector.broadcast %41 : vector<1x256xi1> to vector<4x256xi1>
    %43 = arith.select %42, %37, %40 : vector<4x256xi1>, vector<4x256xf32>
    %44 = vector.extract_strided_slice %37 {offsets = [0, 1], sizes = [4, 255], strides = [1, 1]} : vector<4x256xf32> to vector<4x255xf32>
    %45 = vector.extract_strided_slice %37 {offsets = [0, 0], sizes = [4, 1], strides = [1, 1]} : vector<4x256xf32> to vector<4x1xf32>
    %46 = tpu.concatenate %44, %45 in 1 : vector<4x255xf32>, vector<4x1xf32> -> vector<4x256xf32>
    %47 = vector.shape_cast %22 : vector<1x256xi1> to vector<1x256xi1>
    %48 = vector.broadcast %47 : vector<1x256xi1> to vector<4x256xi1>
    %49 = arith.select %48, %37, %46 : vector<4x256xi1>, vector<4x256xf32>
    %cst_14 = arith.constant 0.000000e+00 : f32
    %50 = vector.broadcast %cst_14 : f32 to vector<4x256xf32>
    %51 = vector.extract_strided_slice %43 {offsets = [0, 240], sizes = [4, 16], strides = [1, 1]} : vector<4x256xf32> to vector<4x16xf32>
    %52 = vector.extract_strided_slice %43 {offsets = [0, 0], sizes = [4, 240], strides = [1, 1]} : vector<4x256xf32> to vector<4x240xf32>
    %53 = tpu.concatenate %51, %52 in 1 : vector<4x16xf32>, vector<4x240xf32> -> vector<4x256xf32>
    %54 = vector.shape_cast %24 : vector<1x256xi1> to vector<1x256xi1>
    %55 = vector.broadcast %54 : vector<1x256xi1> to vector<4x256xi1>
    %56 = arith.select %55, %43, %53 : vector<4x256xi1>, vector<4x256xf32>
    %c0_15 = arith.constant 0 : index
    %c0_16 = arith.constant 0 : index
    %c0_17 = arith.constant 0 : index
    %57 = vector.load %arg5[%c0_15, %c0_16, %c0_17] : memref<9x4x4xf32, #tpu.memory_space<vmem>>, vector<1x4x4xf32>
    %58 = vector.shape_cast %57 : vector<1x4x4xf32> to vector<4x4xf32>
    %cst_18 = arith.constant dense<0.000000e+00> : vector<4x256xf32>
    %59 = tpu.matmul %58, %56, %cst_18 {dimension_numbers = #tpu.dot_dimension_numbers<[1], [0], [0], [1], [0, 0, 1, 1], [], []>} : vector<4x4xf32>, vector<4x256xf32>, vector<4x256xf32> -> vector<4x256xf32>
    %60 = arith.addf %50, %59 : vector<4x256xf32>
    %61 = vector.extract_strided_slice %37 {offsets = [0, 240], sizes = [4, 16], strides = [1, 1]} : vector<4x256xf32> to vector<4x16xf32>
    %62 = vector.extract_strided_slice %37 {offsets = [0, 0], sizes = [4, 240], strides = [1, 1]} : vector<4x256xf32> to vector<4x240xf32>
    %63 = tpu.concatenate %61, %62 in 1 : vector<4x16xf32>, vector<4x240xf32> -> vector<4x256xf32>
    %64 = vector.shape_cast %24 : vector<1x256xi1> to vector<1x256xi1>
    %65 = vector.broadcast %64 : vector<1x256xi1> to vector<4x256xi1>
    %66 = arith.select %65, %37, %63 : vector<4x256xi1>, vector<4x256xf32>
    %c1 = arith.constant 1 : index
    %c0_19 = arith.constant 0 : index
    %c0_20 = arith.constant 0 : index
    %67 = vector.load %arg5[%c1, %c0_19, %c0_20] : memref<9x4x4xf32, #tpu.memory_space<vmem>>, vector<1x4x4xf32>
    %68 = vector.shape_cast %67 : vector<1x4x4xf32> to vector<4x4xf32>
    %cst_21 = arith.constant dense<0.000000e+00> : vector<4x256xf32>
    %69 = tpu.matmul %68, %66, %cst_21 {dimension_numbers = #tpu.dot_dimension_numbers<[1], [0], [0], [1], [0, 0, 1, 1], [], []>} : vector<4x4xf32>, vector<4x256xf32>, vector<4x256xf32> -> vector<4x256xf32>
    %70 = arith.addf %60, %69 : vector<4x256xf32>
    %71 = vector.extract_strided_slice %49 {offsets = [0, 240], sizes = [4, 16], strides = [1, 1]} : vector<4x256xf32> to vector<4x16xf32>
    %72 = vector.extract_strided_slice %49 {offsets = [0, 0], sizes = [4, 240], strides = [1, 1]} : vector<4x256xf32> to vector<4x240xf32>
    %73 = tpu.concatenate %71, %72 in 1 : vector<4x16xf32>, vector<4x240xf32> -> vector<4x256xf32>
    %74 = vector.shape_cast %24 : vector<1x256xi1> to vector<1x256xi1>
    %75 = vector.broadcast %74 : vector<1x256xi1> to vector<4x256xi1>
    %76 = arith.select %75, %49, %73 : vector<4x256xi1>, vector<4x256xf32>
    %c2 = arith.constant 2 : index
    %c0_22 = arith.constant 0 : index
    %c0_23 = arith.constant 0 : index
    %77 = vector.load %arg5[%c2, %c0_22, %c0_23] : memref<9x4x4xf32, #tpu.memory_space<vmem>>, vector<1x4x4xf32>
    %78 = vector.shape_cast %77 : vector<1x4x4xf32> to vector<4x4xf32>
    %cst_24 = arith.constant dense<0.000000e+00> : vector<4x256xf32>
    %79 = tpu.matmul %78, %76, %cst_24 {dimension_numbers = #tpu.dot_dimension_numbers<[1], [0], [0], [1], [0, 0, 1, 1], [], []>} : vector<4x4xf32>, vector<4x256xf32>, vector<4x256xf32> -> vector<4x256xf32>
    %80 = arith.addf %70, %79 : vector<4x256xf32>
    %c3 = arith.constant 3 : index
    %c0_25 = arith.constant 0 : index
    %c0_26 = arith.constant 0 : index
    %81 = vector.load %arg5[%c3, %c0_25, %c0_26] : memref<9x4x4xf32, #tpu.memory_space<vmem>>, vector<1x4x4xf32>
    %82 = vector.shape_cast %81 : vector<1x4x4xf32> to vector<4x4xf32>
    %cst_27 = arith.constant dense<0.000000e+00> : vector<4x256xf32>
    %83 = tpu.matmul %82, %43, %cst_27 {dimension_numbers = #tpu.dot_dimension_numbers<[1], [0], [0], [1], [0, 0, 1, 1], [], []>} : vector<4x4xf32>, vector<4x256xf32>, vector<4x256xf32> -> vector<4x256xf32>
    %84 = arith.addf %80, %83 : vector<4x256xf32>
    %c4 = arith.constant 4 : index
    %c0_28 = arith.constant 0 : index
    %c0_29 = arith.constant 0 : index
    %85 = vector.load %arg5[%c4, %c0_28, %c0_29] : memref<9x4x4xf32, #tpu.memory_space<vmem>>, vector<1x4x4xf32>
    %86 = vector.shape_cast %85 : vector<1x4x4xf32> to vector<4x4xf32>
    %cst_30 = arith.constant dense<0.000000e+00> : vector<4x256xf32>
    %87 = tpu.matmul %86, %37, %cst_30 {dimension_numbers = #tpu.dot_dimension_numbers<[1], [0], [0], [1], [0, 0, 1, 1], [], []>} : vector<4x4xf32>, vector<4x256xf32>, vector<4x256xf32> -> vector<4x256xf32>
    %88 = arith.addf %84, %87 : vector<4x256xf32>
    %c5 = arith.constant 5 : index
    %c0_31 = arith.constant 0 : index
    %c0_32 = arith.constant 0 : index
    %89 = vector.load %arg5[%c5, %c0_31, %c0_32] : memref<9x4x4xf32, #tpu.memory_space<vmem>>, vector<1x4x4xf32>
    %90 = vector.shape_cast %89 : vector<1x4x4xf32> to vector<4x4xf32>
    %cst_33 = arith.constant dense<0.000000e+00> : vector<4x256xf32>
    %91 = tpu.matmul %90, %49, %cst_33 {dimension_numbers = #tpu.dot_dimension_numbers<[1], [0], [0], [1], [0, 0, 1, 1], [], []>} : vector<4x4xf32>, vector<4x256xf32>, vector<4x256xf32> -> vector<4x256xf32>
    %92 = arith.addf %88, %91 : vector<4x256xf32>
    %93 = vector.extract_strided_slice %43 {offsets = [0, 16], sizes = [4, 240], strides = [1, 1]} : vector<4x256xf32> to vector<4x240xf32>
    %94 = vector.extract_strided_slice %43 {offsets = [0, 0], sizes = [4, 16], strides = [1, 1]} : vector<4x256xf32> to vector<4x16xf32>
    %95 = tpu.concatenate %93, %94 in 1 : vector<4x240xf32>, vector<4x16xf32> -> vector<4x256xf32>
    %96 = vector.shape_cast %26 : vector<1x256xi1> to vector<1x256xi1>
    %97 = vector.broadcast %96 : vector<1x256xi1> to vector<4x256xi1>
    %98 = arith.select %97, %43, %95 : vector<4x256xi1>, vector<4x256xf32>
    %c6 = arith.constant 6 : index
    %c0_34 = arith.constant 0 : index
    %c0_35 = arith.constant 0 : index
    %99 = vector.load %arg5[%c6, %c0_34, %c0_35] : memref<9x4x4xf32, #tpu.memory_space<vmem>>, vector<1x4x4xf32>
    %100 = vector.shape_cast %99 : vector<1x4x4xf32> to vector<4x4xf32>
    %cst_36 = arith.constant dense<0.000000e+00> : vector<4x256xf32>
    %101 = tpu.matmul %100, %98, %cst_36 {dimension_numbers = #tpu.dot_dimension_numbers<[1], [0], [0], [1], [0, 0, 1, 1], [], []>} : vector<4x4xf32>, vector<4x256xf32>, vector<4x256xf32> -> vector<4x256xf32>
    %102 = arith.addf %92, %101 : vector<4x256xf32>
    %103 = vector.extract_strided_slice %37 {offsets = [0, 16], sizes = [4, 240], strides = [1, 1]} : vector<4x256xf32> to vector<4x240xf32>
    %104 = vector.extract_strided_slice %37 {offsets = [0, 0], sizes = [4, 16], strides = [1, 1]} : vector<4x256xf32> to vector<4x16xf32>
    %105 = tpu.concatenate %103, %104 in 1 : vector<4x240xf32>, vector<4x16xf32> -> vector<4x256xf32>
    %106 = vector.shape_cast %26 : vector<1x256xi1> to vector<1x256xi1>
    %107 = vector.broadcast %106 : vector<1x256xi1> to vector<4x256xi1>
    %108 = arith.select %107, %37, %105 : vector<4x256xi1>, vector<4x256xf32>
    %c7 = arith.constant 7 : index
    %c0_37 = arith.constant 0 : index
    %c0_38 = arith.constant 0 : index
    %109 = vector.load %arg5[%c7, %c0_37, %c0_38] : memref<9x4x4xf32, #tpu.memory_space<vmem>>, vector<1x4x4xf32>
    %110 = vector.shape_cast %109 : vector<1x4x4xf32> to vector<4x4xf32>
    %cst_39 = arith.constant dense<0.000000e+00> : vector<4x256xf32>
    %111 = tpu.matmul %110, %108, %cst_39 {dimension_numbers = #tpu.dot_dimension_numbers<[1], [0], [0], [1], [0, 0, 1, 1], [], []>} : vector<4x4xf32>, vector<4x256xf32>, vector<4x256xf32> -> vector<4x256xf32>
    %112 = arith.addf %102, %111 : vector<4x256xf32>
    %113 = vector.extract_strided_slice %49 {offsets = [0, 16], sizes = [4, 240], strides = [1, 1]} : vector<4x256xf32> to vector<4x240xf32>
    %114 = vector.extract_strided_slice %49 {offsets = [0, 0], sizes = [4, 16], strides = [1, 1]} : vector<4x256xf32> to vector<4x16xf32>
    %115 = tpu.concatenate %113, %114 in 1 : vector<4x240xf32>, vector<4x16xf32> -> vector<4x256xf32>
    %116 = vector.shape_cast %26 : vector<1x256xi1> to vector<1x256xi1>
    %117 = vector.broadcast %116 : vector<1x256xi1> to vector<4x256xi1>
    %118 = arith.select %117, %49, %115 : vector<4x256xi1>, vector<4x256xf32>
    %c8 = arith.constant 8 : index
    %c0_40 = arith.constant 0 : index
    %c0_41 = arith.constant 0 : index
    %119 = vector.load %arg5[%c8, %c0_40, %c0_41] : memref<9x4x4xf32, #tpu.memory_space<vmem>>, vector<1x4x4xf32>
    %120 = vector.shape_cast %119 : vector<1x4x4xf32> to vector<4x4xf32>
    %cst_42 = arith.constant dense<0.000000e+00> : vector<4x256xf32>
    %121 = tpu.matmul %120, %118, %cst_42 {dimension_numbers = #tpu.dot_dimension_numbers<[1], [0], [0], [1], [0, 0, 1, 1], [], []>} : vector<4x4xf32>, vector<4x256xf32>, vector<4x256xf32> -> vector<4x256xf32>
    %122 = arith.addf %112, %121 : vector<4x256xf32>
    %c0_43 = arith.constant 0 : index
    %c0_44 = arith.constant 0 : index
    %123 = vector.load %arg6[%c0_43, %c0_44] : memref<4x1xf32, #tpu.memory_space<vmem>>, vector<4x1xf32>
    %124 = vector.broadcast %123 : vector<4x1xf32> to vector<4x256xf32>
    %125 = arith.addf %122, %124 : vector<4x256xf32>
    %cst_45 = arith.constant 0.000000e+00 : f32
    %126 = vector.broadcast %cst_45 : f32 to vector<4x256xf32>
    %127 = arith.cmpf oge, %125, %126 : vector<4x256xf32>
    %c0_46 = arith.constant 0 : index
    %c0_47 = arith.constant 0 : index
    %128 = vector.load %arg7[%c0_46, %c0_47] : memref<4x1xf32, #tpu.memory_space<vmem>>, vector<4x1xf32>
    %129 = vector.broadcast %128 : vector<4x1xf32> to vector<4x256xf32>
    %130 = arith.mulf %129, %125 : vector<4x256xf32>
    %131 = arith.select %127, %125, %130 : vector<4x256xi1>, vector<4x256xf32>
    %c0_48 = arith.constant 0 : index
    %c0_49 = arith.constant 0 : index
    %132 = vector.load %arg8[%c0_48, %c0_49] : memref<4x4xf32, #tpu.memory_space<vmem>>, vector<4x4xf32>
    %cst_50 = arith.constant dense<0.000000e+00> : vector<4x256xf32>
    %133 = tpu.matmul %132, %131, %cst_50 {dimension_numbers = #tpu.dot_dimension_numbers<[1], [0], [0], [1], [0, 0, 1, 1], [], []>} : vector<4x4xf32>, vector<4x256xf32>, vector<4x256xf32> -> vector<4x256xf32>
    %c0_51 = arith.constant 0 : index
    %c0_52 = arith.constant 0 : index
    %134 = vector.load %arg9[%c0_51, %c0_52] : memref<4x1xf32, #tpu.memory_space<vmem>>, vector<4x1xf32>
    %135 = vector.broadcast %134 : vector<4x1xf32> to vector<4x256xf32>
    %136 = arith.addf %133, %135 : vector<4x256xf32>
    %cst_53 = arith.constant 0.000000e+00 : f32
    %137 = vector.broadcast %cst_53 : f32 to vector<4x256xf32>
    %138 = arith.cmpf oge, %136, %137 : vector<4x256xf32>
    %c0_54 = arith.constant 0 : index
    %c0_55 = arith.constant 0 : index
    %139 = vector.load %arg10[%c0_54, %c0_55] : memref<4x1xf32, #tpu.memory_space<vmem>>, vector<4x1xf32>
    %140 = vector.broadcast %139 : vector<4x1xf32> to vector<4x256xf32>
    %141 = arith.mulf %140, %136 : vector<4x256xf32>
    %142 = arith.select %138, %136, %141 : vector<4x256xi1>, vector<4x256xf32>
    %143 = arith.addf %142, %1 : vector<4x256xf32>
    %c0_56 = arith.constant 0 : index
    %c0_57 = arith.constant 0 : index
    %c0_58 = arith.constant 0 : index
    %144 = vector.load %arg11[%c0_56, %c0_57, %c0_58] : memref<1x4x256xf32, #tpu.memory_space<vmem>>, vector<1x4x256xf32>
    %145 = vector.shape_cast %144 : vector<1x4x256xf32> to vector<4x256xf32>
    %146 = vector.shape_cast %143 : vector<4x256xf32> to vector<1x4x256xf32>
    tpu.vector_store %arg11[%c0_56, %c0_57, %c0_58], %146 {strides = array<i32>} : memref<1x4x256xf32, #tpu.memory_space<vmem>>, vector<1x4x256xf32>,
    return
  }
  func.func @transform_0(%arg0: i32) -> (i32, i32, i32) {
    %c0_i32 = arith.constant 0 : i32
    %c0_i32_0 = arith.constant 0 : i32
    %c0_i32_1 = arith.constant 0 : i32
    return %arg0, %c0_i32, %c0_i32_0 : i32, i32, i32
  }
  func.func @transform_1(%arg0: i32) -> (i32, i32) {
    %c0_i32 = arith.constant 0 : i32
    %c0_i32_0 = arith.constant 0 : i32
    %c0_i32_1 = arith.constant 0 : i32
    return %c0_i32, %c0_i32_0 : i32, i32
  }
  func.func @transform_2(%arg0: i32) -> (i32, i32) {
    %c0_i32 = arith.constant 0 : i32
    %c0_i32_0 = arith.constant 0 : i32
    %c0_i32_1 = arith.constant 0 : i32
    return %c0_i32, %c0_i32_0 : i32, i32
  }
  func.func @transform_3(%arg0: i32) -> (i32, i32) {
    %c0_i32 = arith.constant 0 : i32
    %c0_i32_0 = arith.constant 0 : i32
    %c0_i32_1 = arith.constant 0 : i32
    return %c0_i32, %c0_i32_0 : i32, i32
  }
  func.func @transform_4(%arg0: i32) -> (i32, i32, i32) {
    %c0_i32 = arith.constant 0 : i32
    %c0_i32_0 = arith.constant 0 : i32
    %c0_i32_1 = arith.constant 0 : i32
    %c0_i32_2 = arith.constant 0 : i32
    return %c0_i32, %c0_i32_0, %c0_i32_1 : i32, i32, i32
  }
  func.func @transform_5(%arg0: i32) -> (i32, i32) {
    %c0_i32 = arith.constant 0 : i32
    %c0_i32_0 = arith.constant 0 : i32
    %c0_i32_1 = arith.constant 0 : i32
    return %c0_i32, %c0_i32_0 : i32, i32
  }
  func.func @transform_6(%arg0: i32) -> (i32, i32) {
    %c0_i32 = arith.constant 0 : i32
    %c0_i32_0 = arith.constant 0 : i32
    %c0_i32_1 = arith.constant 0 : i32
    return %c0_i32, %c0_i32_0 : i32, i32
  }
  func.func @transform_7(%arg0: i32) -> (i32, i32) {
    %c0_i32 = arith.constant 0 : i32
    %c0_i32_0 = arith.constant 0 : i32
    %c0_i32_1 = arith.constant 0 : i32
    return %c0_i32, %c0_i32_0 : i32, i32
  }
  func.func @transform_8(%arg0: i32) -> (i32, i32) {
    %c0_i32 = arith.constant 0 : i32
    %c0_i32_0 = arith.constant 0 : i32
    %c0_i32_1 = arith.constant 0 : i32
    return %c0_i32, %c0_i32_0 : i32, i32
  }
  func.func @transform_9(%arg0: i32) -> (i32, i32) {
    %c0_i32 = arith.constant 0 : i32
    %c0_i32_0 = arith.constant 0 : i32
    %c0_i32_1 = arith.constant 0 : i32
    return %c0_i32, %c0_i32_0 : i32, i32
  }
  func.func @transform_10(%arg0: i32) -> (i32, i32, i32) {
    %c0_i32 = arith.constant 0 : i32
    %c0_i32_0 = arith.constant 0 : i32
    %c0_i32_1 = arith.constant 0 : i32
    return %arg0, %c0_i32, %c0_i32_0 : i32, i32, i32
  }
}

</mosaic_0001>

<bundles_post_ra>
// kernel: resnet_block_forward.1
= control target key start
LH: loop header
LB: loop body
LE: loop exit
PB: predicated region body
PF: predicated region fallthrough
CT: control target
= control target key end

     0   :  { %s1694_s13 = smov 0   ;;  %s1902_s0 = inlined_call_operand.vmem [shape: f32[2,4,256], index: 0, kind: input, shape index: {}]   ;;  %s1903_s1 = inlined_call_operand.vmem [shape: f32[4,4], index: 1, kind: input, shape index: {}]   ;;  %s1904_s2 = inlined_call_operand.vmem [shape: f32[4,1], index: 2, kind: input, shape index: {}]   ;;  %s1905_s3 = inlined_call_operand.vmem [shape: f32[4,1], index: 3, kind: input, shape index: {}]   ;;  %s1906_s4 = inlined_call_operand.vmem [shape: f32[9,4,4], index: 4, kind: input, shape index: {}]   ;;  %s1907_s5 = inlined_call_operand.vmem [shape: f32[4,1], index: 5, kind: input, shape index: {}]   ;;  %s1908_s6 = inlined_call_operand.vmem [shape: f32[4,1], index: 6, kind: input, shape index: {}]   ;;  %s1909_s7 = inlined_call_operand.vmem [shape: f32[4,4], index: 7, kind: input, shape index: {}]   ;;  %s1910_s8 = inlined_call_operand.vmem [shape: f32[4,1], index: 8, kind: input, shape index: {}]   ;;  %s1911_s9 = inlined_call_operand.vmem [shape: f32[4,1], index: 9, kind: input, shape index: {}]   ;;  %s1912_s10 = inlined_call_operand.vmem [shape: f32[2,4,256], index: 10, kind: output, shape index: {}]  }
   0x1 LB: > { %s1538_s14 = sadd.s32 4294967295, %s1631_s13   ;;  %p1542_p0 = scmp.ge.s32.totalorder %s1631_s13, 1  ;;  %s1631_s13 = sphi %s1694_s13, %s20_s13  }
   0x2   : > { %p312_p1 = scmp.lt.s32.totalorder %s1631_s13, 3 }
   0x4   : > { %p313_p2 = pnand %p1542_p0, %p312_p1 }
   0x5   : > { %p350_p3 = scmp.lt.s32.totalorder (!%p313_p2), %s1538_s14, 1  ;;  %v1633_v0 = vmov (!%p313_p2), 0.0   ;;  %v397_v1 = vld [vmem:[%s1904_s2] sm:$0xf] (!%p313_p2)  ;;  %v1634_v2 = vmov (!%p313_p2), 0   ;;  %vm409_vm0 = vcmask (!%p313_p2), 1043456   ;;  %v361_v17 = vlaneseq (!%p313_p2) }
   0x6   : > { %316 = sbr.rel (%p313_p2) target bundleno = 944 (0x3b0), region = 60  ;;  %478 = vmatprep.mubr.f32.mxu0 (!%p313_p2), %v1633_v0  ;;  %893 = vmatprep.mubr.f32.mxu1 (!%p313_p2), %v1633_v0  ;;  %v487_v3 = vld [vmem:[%s1905_s3] sm:$0xf] (!%p313_p2)  ;;  %vm405_vm1 = vcmask (!%p313_p2), 31744   ;;  %s1635_s25 = smov (!%p313_p2), 127   ;;  %vm504_vm4 = vcmask (!%p313_p2), 7168  }
   0x7   : > { %1622 = vset.pattern.permute.xlu0 (!%p313_p2), %v1634_v2  ;;  %1623 = vset.pattern.permute.xlu1 (!%p313_p2), %v1634_v2  ;;  %v396_v6 = vld [vmem:[%s1903_s1] sm:$0xf] (!%p313_p2)  ;;  %s1636_s26 = smov (!%p313_p2), 1   ;;  %v1741_v18 = vand.u32 (!%p313_p2), 127, %v361_v17  ;;  %vm519_vm7 = vcmask (!%p313_p2), 1039360   ;;  %s1637_s27 = smov (!%p313_p2), 112  }
   0x8   : > { %400 = vperm.xlu0 (!%p313_p2), %1622, %v397_v1   ;;  %v1561_v28 = vld [vmem:[%s1906_s4 + $0xc] sm:$0xf] (!%p313_p2)  ;;  %s1638_s30 = smov (!%p313_p2), 16   ;;  %v1565_v34 = vld [vmem:[%s1906_s4 + $0x10] sm:$0xf] (!%p313_p2)  ;;  %vm1070_vm10 = vcmask (!%p313_p2), 916480  }
   0x9   : > { %v1744_v19 = vadd.s32 (!%p313_p2), 128, %v1741_v18  ;;  %v368_v20 = vand.u32 (!%p313_p2), 15, %v1741_v18  ;;  %v1569_v36 = vld [vmem:[%s1906_s4 + $0x14] sm:$0xf] (!%p313_p2)  ;;  %v1356_v37 = vld [vmem:[%s1907_s5] sm:$0xf] (!%p313_p2) }
   0xa   : > { %v1377_v38 = vld [vmem:[%s1910_s8] sm:$0xf] (!%p313_p2)  ;;  %v1573_v45 = vld [vmem:[%s1906_s4 + $0x18] sm:$0xf] (!%p313_p2)  ;;  %vm538_vm12 = vcmask (!%p313_p2), 130048   ;;  %vm392_vm13 = vcmp.lt.s32.totalorder (!%p313_p2), %v1741_v18, 16 }
   0xb   : > { %v375_v21 = vand.u32 (!%p313_p2), 15, %v1744_v19  ;;  %vm388_vm5 = vcmp.eq.s32.totalorder (!%p313_p2), %v368_v20, 0  ;;  %vm390_vm9 = vcmp.eq.s32.totalorder (!%p313_p2), %v368_v20, 15  ;;  %v1366_v39 = vld [vmem:[%s1908_s6] sm:$0xf] (!%p313_p2)  ;;  %vm395_vm11 = vcmp.ge.s32.totalorder (!%p313_p2), %v1744_v19, 240 }
   0xc   : > { %490 = vperm.xlu0 (!%p313_p2), %1622, %v487_v3   ;;  %v1465_v40 = vld [vmem:[%s1911_s9] sm:$0xf] (!%p313_p2)  ;;  %v1550_v51 = vld [vmem:[%s1906_s4 + $0x4] sm:$0xf] (!%p313_p2)  ;;  %v1577_v57 = vld [vmem:[%s1906_s4 + $0x1c] sm:$0xf] (!%p313_p2) }
   0xd   : > { %s1914_s14 = smov (!%p350_p3, %s1538_s14), 1  ;;  %vm389_vm6 = vcmp.eq.s32.totalorder %v375_v21, 0  ;;  %vm391_vm8 = vcmp.eq.s32.totalorder %v375_v21, 15  ;;  %v549_v63 = vld [vmem:[%s1906_s4] sm:$0xf] }
   0xe   : > { %s1590_s17 = sshll.u32 %s1914_s14, 3 }
   0xf   : > { %s354_s22 = scalar_lea.vmem %s1902_s0, %s1590_s17 }
  0x10   : > { %v1718_v4 = vld [vmem:[%s354_s22] sm:$0xff] }
  0x11   : > { %v1722_v5 = vcombine.high %v1718_v4, %v1718_v4 }
  0x13   : > { %1547 = vmatprep.subr.msk.mxu0 %vm409_vm0, %v1722_v5 }
  0x14   : > { %1548 = vmatpush1.msk.msra.mxu0 %vm409_vm0, %v1718_v4 }
  0x15   : > { %1549 = vmatmul.mubr.msk.f32.vlgmr.msra.gmra.mrb[0].mxu0 %vm405_vm1, %v396_v6 }
  0x16   : > { %636 = vmatprep.mubr.f32.mxu0 %v1633_v0 }
  0x87   : > { %v401_v7 = vpop.permute.xlu0 %400 }
  0x8b   : > { %v491_v11 = vpop.permute.xlu0 %490 }
  0xe8   : > { %v480_v8 = vpop.f32.mrb[0].mxu0 }
  0xe9   : > { %v481_v9 = vadd.f32 %v480_v8, %v401_v7  ;;  %v482_v10 = vpop.f32.mrb[1].mxu0  ;;  %v1581_v8 = vld [vmem:[%s1906_s4 + $0x20] sm:$0xf] }
  0xea   : > { %v483_v12 = vadd.f32 %v482_v10, %v401_v7 }
  0xeb   : > { %vm485_vm2 = vcmp.ge.f32.partialorder %v481_v9, 0.0  ;;  %v493_v13 = vmul.f32 %v491_v11, %v481_v9 }
  0xec   : > { %vm486_vm3 = vcmp.ge.f32.partialorder %v483_v12, 0.0  ;;  %v494_v14 = vmul.f32 %v491_v11, %v483_v12 }
  0xed   : > { %v1733_v15 = vsel %vm485_vm2, %v481_v9, %v493_v13 }
  0xee   : > { %v1735_v16 = vsel %vm486_vm3, %v483_v12, %v494_v14  ;;  %515 = vrot.lane.b32.xlu0 %v1733_v15, %s1635_s25  ;;  %v1557_v14 = vld [vmem:[%s1906_s4 + $0x8] sm:$0xf] }
  0xef   : > { %498 = vrot.lane.b32.xlu1 %v1735_v16, %s1636_s26 }
  0xf3   : > { %502 = vrot.lane.b32.xlu1 %v1733_v15, %s1636_s26 }
  0xf7   : > { %517 = vrot.lane.b32.xlu1 %v1735_v16, %s1635_s25  ;;  %s359_s25 = scalar_lea.vmem %s1912_s10, %s1590_s17 }
 0x160   : > { %v516_v29 = vpop.permute.xlu0 %515 }
 0x161   : > { %v499_v22 = vpop.permute.xlu1 %498 }
 0x165   : > { %v503_v23 = vpop.permute.xlu1 %502 }
 0x166   : > { %v505_v24 = vsel %vm504_vm4, %v503_v23, %v499_v22  ;;  %v508_v25 = vsel %vm504_vm4, %v499_v22, %v503_v23 }
 0x167   : > { %v1749_v26 = vsel %vm388_vm5, %v1733_v15, %v508_v25  ;;  %v514_v27 = vsel %vm389_vm6, %v1735_v16, %v505_v24 }
 0x168   : > { %1066 = vrot.lane.b32.xlu0 %v1749_v26, %s1637_s27  ;;  %1068 = vrot.lane.b32.xlu1 %v514_v27, %s1637_s27 }
 0x169   : > { %1562 = vmatprep.subr.msk.mxu1 %vm409_vm0, %v514_v27  ;;  %v518_v30 = vpop.permute.xlu1 %517 }
 0x16a   : > { %1563 = vmatpush1.msk.msra.mxu1 %vm409_vm0, %v1749_v26  ;;  %v524_v31 = vsel %vm519_vm7, %v518_v30, %v516_v29  ;;  %v520_v33 = vsel %vm519_vm7, %v516_v29, %v518_v30  ;;  %v1376_v29 = vld [vmem:[%s1909_s7] sm:$0xf] }
 0x16b   : > { %1564 = vmatmul.mubr.msk.f32.vlgmr.msra.gmra.mrb[0].mxu1 %vm405_vm1, %v1561_v28  ;;  %1566 = vmatprep.subr.msk.mxu1 %vm409_vm0, %v1735_v16  ;;  %v1766_v32 = vsel %vm391_vm8, %v1735_v16, %v524_v31  ;;  %v1784_v35 = vsel %vm390_vm9, %v1733_v15, %v520_v33 }
 0x16c   : > { %1567 = vmatpush1.msk.msra.mxu1 %vm409_vm0, %v1733_v15  ;;  %550 = vrot.lane.b32.xlu0 %v1735_v16, %s1638_s30 }
 0x16d   : > { %553 = vrot.lane.b32.xlu1 %v1733_v15, %s1638_s30  ;;  %1570 = vmatprep.subr.msk.mxu1 %vm409_vm0, %v1766_v32 }
 0x16e   : > { %975 = vmatprep.mubr.f32.mxu1 %v1633_v0 }
 0x170   : > { %1166 = vrot.lane.b32.xlu0 %v1733_v15, %s1637_s27 }
 0x171   : > { %1168 = vrot.lane.b32.xlu1 %v1735_v16, %s1637_s27 }
 0x173   : > { %1568 = vmatmul.mubr.msk.f32.vlgmr.msra.gmra.mrb[0].mxu1 %vm405_vm1, %v1565_v34 }
 0x174   : > { %1571 = vmatpush1.msk.msra.mxu1 %vm409_vm0, %v1784_v35  ;;  %532 = vrot.lane.b32.xlu0 %v514_v27, %s1638_s30 }
 0x175   : > { %536 = vrot.lane.b32.xlu1 %v1749_v26, %s1638_s30  ;;  %1057 = vmatprep.mubr.f32.mxu1 %v1633_v0 }
 0x178   : > { %1261 = vrot.lane.b32.xlu0 %v1784_v35, %s1637_s27 }
 0x179   : > { %1263 = vrot.lane.b32.xlu1 %v1766_v32, %s1637_s27 }
 0x17b   : > { %1572 = vmatmul.mubr.msk.f32.vlgmr.msra.gmra.mrb[0].mxu1 %vm405_vm1, %v1569_v36 }
 0x17c   : > { %724 = vrot.lane.b32.xlu0 %v1766_v32, %s1638_s30  ;;  %1157 = vmatprep.mubr.f32.mxu1 %v1633_v0 }
 0x17d   : > { %728 = vrot.lane.b32.xlu1 %v1784_v35, %s1638_s30 }
 0x180   : > { %1359 = vperm.xlu0 %1622, %v1356_v37  }
 0x181   : > { %1369 = vperm.xlu1 %1623, %v1366_v39  }
 0x184   : > { %1380 = vperm.xlu0 %1622, %v1377_v38  }
 0x185   : > { %1468 = vperm.xlu1 %1623, %v1465_v40  }
 0x1da   : > { %v1067_v41 = vpop.permute.xlu0 %1066  ;;  %v1069_v42 = vpop.permute.xlu1 %1068 }
 0x1db   : > { %v1075_v43 = vsel %vm1070_vm10, %v1069_v42, %v1067_v41  ;;  %v1071_v46 = vsel %vm1070_vm10, %v1067_v41, %v1069_v42 }
 0x1dc   : > { %v1081_v44 = vsel %vm395_vm11, %v514_v27, %v1075_v43 }
 0x1dd   : > { %1574 = vmatprep.subr.msk.mxu1 %vm409_vm0, %v1081_v44 }
 0x1de   : > { %v551_v47 = vpop.permute.xlu0 %550  ;;  %1575 = vmatpush1.msk.msra.mxu1 %vm409_vm0, %v1071_v46 }
 0x1df   : > { %v554_v48 = vpop.permute.xlu1 %553  ;;  %1576 = vmatmul.mubr.msk.f32.vlgmr.msra.gmra.mrb[0].mxu1 %vm405_vm1, %v1573_v45 }
 0x1e0   : > { %v555_v49 = vsel %vm538_vm12, %v554_v48, %v551_v47  ;;  %v558_v50 = vsel %vm538_vm12, %v551_v47, %v554_v48  ;;  %1252 = vmatprep.mubr.f32.mxu1 %v1633_v0 }
 0x1e1   : > { %v559_v52 = vsel %vm392_vm13, %v1733_v15, %v558_v50  ;;  %1551 = vmatprep.subr.msk.mxu0 %vm409_vm0, %v555_v49 }
 0x1e2   : > { %1552 = vmatpush1.msk.msra.mxu0 %vm409_vm0, %v559_v52  ;;  %v1167_v53 = vpop.permute.xlu0 %1166 }
 0x1e3   : > { %1553 = vmatmul.mubr.msk.f32.vlgmr.msra.gmra.mrb[2].mxu0 %vm405_vm1, %v1550_v51  ;;  %v1169_v54 = vpop.permute.xlu1 %1168 }
 0x1e4   : > { %v1174_v55 = vsel %vm1070_vm10, %v1169_v54, %v1167_v53  ;;  %716 = vmatprep.mubr.f32.mxu0 %v1633_v0  ;;  %v1170_v58 = vsel %vm1070_vm10, %v1167_v53, %v1169_v54 }
 0x1e5   : > { %v1176_v56 = vsel %vm395_vm11, %v1735_v16, %v1174_v55 }
 0x1e6   : > { %1578 = vmatprep.subr.msk.mxu1 %vm409_vm0, %v1176_v56  ;;  %v533_v59 = vpop.permute.xlu0 %532 }
 0x1e7   : > { %1579 = vmatpush1.msk.msra.mxu1 %vm409_vm0, %v1170_v58  ;;  %v537_v60 = vpop.permute.xlu1 %536 }
 0x1e8   : > { %v539_v61 = vsel %vm538_vm12, %v537_v60, %v533_v59  ;;  %v542_v62 = vsel %vm538_vm12, %v533_v59, %v537_v60  ;;  %1580 = vmatmul.mubr.msk.f32.vlgmr.msra.gmra.mrb[0].mxu1 %vm405_vm1, %v1577_v57 }
 0x1e9   : > { %v547_v1 = vsel %vm392_vm13, %v1749_v26, %v542_v62  ;;  %1554 = vmatprep.subr.msk.mxu0 %vm409_vm0, %v539_v61  ;;  %1347 = vmatprep.mubr.f32.mxu1 %v1633_v0 }
 0x1ea   : > { %1555 = vmatpush1.msk.msra.mxu0 %vm409_vm0, %v547_v1  ;;  %v1262_v2 = vpop.permute.xlu0 %1261 }
 0x1eb   : > { %1556 = vmatmul.mubr.msk.f32.vlgmr.msra.gmra.mrb[2].mxu0 %vm405_vm1, %v549_v63  ;;  %v1264_v3 = vpop.permute.xlu1 %1263 }
 0x1ec   : > { %v1269_v6 = vsel %vm1070_vm10, %v1264_v3, %v1262_v2  ;;  %811 = vmatprep.mubr.f32.mxu0 %v1633_v0  ;;  %v1265_v9 = vsel %vm1070_vm10, %v1262_v2, %v1264_v3 }
 0x1ed   : > { %v1271_v7 = vsel %vm395_vm11, %v1766_v32, %v1269_v6 }
 0x1ee   : > { %1582 = vmatprep.subr.msk.mxu1 %vm409_vm0, %v1271_v7  ;;  %v725_v10 = vpop.permute.xlu0 %724 }
 0x1ef   : > { %1583 = vmatpush1.msk.msra.mxu1 %vm409_vm0, %v1265_v9  ;;  %v729_v11 = vpop.permute.xlu1 %728 }
 0x1f0   : > { %v730_v12 = vsel %vm538_vm12, %v729_v11, %v725_v10  ;;  %v733_v13 = vsel %vm538_vm12, %v725_v10, %v729_v11  ;;  %1584 = vmatmul.mubr.msk.f32.vlgmr.msra.gmra.mrb[0].mxu1 %vm405_vm1, %v1581_v8 }
 0x1f1   : > { %v734_v15 = vsel %vm392_vm13, %v1784_v35, %v733_v13  ;;  %1558 = vmatprep.subr.msk.mxu0 %vm409_vm0, %v730_v12 }
 0x1f2   : > { %1559 = vmatpush1.msk.msra.mxu0 %vm409_vm0, %v734_v15 }
 0x1f3   : > { %1560 = vmatmul.mubr.msk.f32.vlgmr.msra.gmra.mrb[2].mxu0 %vm405_vm1, %v1557_v14 }
 0x1f4   : > { %1456 = vmatprep.mubr.f32.mxu0 %v1633_v0 }
 0x1ff   : > { %v1360_v22 = vpop.permute.xlu0 %1359 }
 0x200   : > { %v1370_v26 = vpop.permute.xlu1 %1369 }
 0x203   : > { %v1381_v30 = vpop.permute.xlu0 %1380 }
 0x204   : > { %v1469_v34 = vpop.permute.xlu1 %1468 }
 0x2c3   : > { %v1349_v16 = vpop.f32.mrb[0].mxu1 }
 0x2c4   : > { %v1351_v17 = vpop.f32.mrb[1].mxu1 }
 0x2c6   : > { %v813_v19 = vpop.f32.mrb[2].mxu0 }
 0x2c7   : > { %v1592_v20 = vadd.f32 %v1349_v16, %v813_v19  ;;  %v815_v21 = vpop.f32.mrb[3].mxu0 }
 0x2c8   : > { %v1593_v23 = vadd.f32 %v1351_v17, %v815_v21 }
 0x2c9   : > { %v1362_v24 = vadd.f32 %v1592_v20, %v1360_v22 }
 0x2ca   : > { %v1363_v25 = vadd.f32 %v1593_v23, %v1360_v22 }
 0x2cb   : > { %v1372_v18 = vmul.f32 %v1370_v26, %v1362_v24  ;;  %vm1364_vm14 = vcmp.ge.f32.partialorder %v1362_v24, 0.0 }
 0x2cc   : > { %v1373_v27 = vmul.f32 %v1370_v26, %v1363_v25  ;;  %vm1365_vm15 = vcmp.ge.f32.partialorder %v1363_v25, 0.0 }
 0x2cd   : > { %v1374_v0 = vsel %vm1364_vm14, %v1362_v24, %v1372_v18 }
 0x2ce   : > { %v1375_v28 = vsel %vm1365_vm15, %v1363_v25, %v1373_v27 }
 0x2cf   : > { %1585 = vmatprep.subr.msk.mxu0 %vm409_vm0, %v1375_v28 }
 0x2d0   : > { %1586 = vmatpush1.msk.msra.mxu0 %vm409_vm0, %v1374_v0 }
 0x2d1   : > { %1587 = vmatmul.mubr.msk.f32.vlgmr.msra.gmra.mrb[4].mxu0 %vm405_vm1, %v1376_v29 }
 0x3a4   : > { %v1458_v31 = vpop.f32.mrb[4].mxu0 }
 0x3a5   : > { %v1459_v32 = vadd.f32 %v1458_v31, %v1381_v30  ;;  %v1460_v33 = vpop.f32.mrb[5].mxu0 }
 0x3a6   : > { %v1461_v35 = vadd.f32 %v1460_v33, %v1381_v30 }
 0x3a7   : > { %vm1463_vm2 = vcmp.ge.f32.partialorder %v1459_v32, 0.0  ;;  %v1471_v36 = vmul.f32 %v1469_v34, %v1459_v32 }
 0x3a8   : > { %vm1464_vm3 = vcmp.ge.f32.partialorder %v1461_v35, 0.0  ;;  %v1472_v37 = vmul.f32 %v1469_v34, %v1461_v35 }
 0x3a9   : > { %v1473_v38 = vsel %vm1463_vm2, %v1459_v32, %v1471_v36 }
 0x3aa   : > { %v1476_v39 = vadd.f32 %v1473_v38, %v1718_v4  ;;  %v1474_v40 = vsel %vm1464_vm3, %v1461_v35, %v1472_v37 }
 0x3ab   : > { %v1477_v41 = vadd.f32 %v1474_v40, %v1722_v5 }
 0x3ad   : > { %v1480_v42 = vcombine.low %v1476_v39, %v1477_v41 }
 0x3af   : > { %1482 = vst [vmem:[%s359_s25] sm:$0xff] %v1480_v42 }
 0x3b0 PF: > { %s20_s13 = sadd.s32 1, %s1631_s13  }
 0x3b1   : > { %p17_p4 = scmp.ge.s32.totalorder %s20_s13, 4  }
 0x3b3   :  { %19 = sbr.rel (!%p17_p4) target bundleno = 1 (0x1), region = 98 }

</bundles_post_ra>
